<compile_context>
chip_gen: v7x
topology: tpu7x:2x2x1
jax: 0.10.0
libtpu: 0.0.40
codegen_flags: <defaults>
</compile_context>

<pallas_src>
import math
import numpy as np
import jax
import jax.numpy as jnp
from jax.experimental import pallas as pl
from jax.experimental.pallas import tpu as pltpu


def make_pos_embed(max_seq_len, d_model):
    """Exact port of the PyTorch make_pos_embed (expects even d_model)."""
    pe = np.zeros((max_seq_len, d_model), dtype=np.float32)
    for pos in range(max_seq_len):
        for i in range(0, d_model, 2):
            pe[pos, i] = math.sin(pos / 10000 ** (2 * i / d_model))
            pe[pos, i + 1] = math.cos(pos / 10000 ** (2 * (i + 1) / d_model))
    return jnp.asarray(pe)


def _layernorm(x, gamma, beta, eps=1e-12):
    mu = jnp.mean(x, axis=-1, keepdims=True)
    xc = x - mu
    var = jnp.mean(xc * xc, axis=-1, keepdims=True)
    return xc * jax.lax.rsqrt(var + eps) * gamma + beta


# -----------------------------------------------------------------------------
# Kernel
# -----------------------------------------------------------------------------
def uniter_kernel(feat_ref, meta_ref, type_ref,
                  w_ref, slab_ref, pos_tab_ref,
                  out_ref):
    cdt = w_ref.dtype                     # MXU compute dtype (bf16 or f32)
    tl = feat_ref.shape[0]
    npos = pos_tab_ref.shape[0]           # padded (multiple of 8) position count

    ids = meta_ref[:, 0:1]                              # (TL, 1) int32 pos ids
    msk = meta_ref[:, 1:2].astype(jnp.float32)          # (TL, 1) 0/1 mask

    # img_linear on the MXU straight off the DMA'd (bf16) feat tile, f32 acc.
    # Mask-embedding add is folded through the linear layer by linearity:
    #   (feat + m*e1) @ W^T + b == feat @ W^T + b + m*(e1 @ W^T)
    x = jnp.dot(feat_ref[...], w_ref[...], preferred_element_type=jnp.float32)
    x = x + slab_ref[0:1, :] + msk * slab_ref[5:6, :]

    # img_layer_norm (f32 math)
    x = _layernorm(x, slab_ref[1:2, :], slab_ref[2:3, :])

    # position embedding lookup in-kernel: one-hot (TL, npos) @ (npos, H) on MXU
    onehot = (ids == jax.lax.broadcasted_iota(jnp.int32, (tl, npos), 1)).astype(cdt)
    pos = jnp.dot(onehot, pos_tab_ref[...], preferred_element_type=jnp.float32)

    x = x + pos + type_ref[...].astype(jnp.float32)

    # final LayerNorm; dropout is identity in eval mode
    x = _layernorm(x, slab_ref[3:4, :], slab_ref[4:5, :])
    out_ref[...] = x.astype(out_ref.dtype)


# -----------------------------------------------------------------------------
# Parameter prep (done ONCE, outside the per-call critical path)
# -----------------------------------------------------------------------------
def prepare_params(params, compute_dtype=jnp.bfloat16):
    cdt = jnp.dtype(compute_dtype)
    w = jnp.asarray(params["img_linear_w"], jnp.float32)        # (H, D_img)
    H, D_img = w.shape
    w_t = w.T.astype(cdt)                                       # hoisted transpose + cast

    # mask-embedding row 1 projected through the linear layer (f32, exact fold)
    mrow_proj = jnp.asarray(params["mask_emb"], jnp.float32)[1] @ w.T     # (H,)

    # pack bias + both LN gamma/beta + projected mask row into one (8, H) slab
    slab = jnp.zeros((8, H), jnp.float32)
    slab = slab.at[0].set(jnp.asarray(params["img_linear_b"], jnp.float32))
    slab = slab.at[1].set(jnp.asarray(params["img_ln_g"], jnp.float32))
    slab = slab.at[2].set(jnp.asarray(params["img_ln_b"], jnp.float32))
    slab = slab.at[3].set(jnp.asarray(params["ln_g"], jnp.float32))
    slab = slab.at[4].set(jnp.asarray(params["ln_b"], jnp.float32))
    slab = slab.at[5].set(mrow_proj)

    pos = jnp.asarray(params["pos_table"], jnp.float32)         # (n_pos, H)
    n_pos = pos.shape[0]
    n_pos_pad = -(-n_pos // 8) * 8                              # 10 -> 16
    pos_tab = jnp.zeros((n_pos_pad, H), jnp.float32).at[:n_pos].set(pos).astype(cdt)

    return {"w_t": w_t, "slab": slab, "pos_tab": pos_tab,
            "H": H, "D_img": D_img, "n_pos": n_pos}


# -----------------------------------------------------------------------------
# Wrapper
# -----------------------------------------------------------------------------
def uniter_r2p1d_embeddings(img_feat, img_pos_ids, type_embeddings, img_masks,
                            prepped, *, tile_rows=512, out_dtype=None,
                            single_buffer_params=True):
    B, L, D_img = img_feat.shape
    H = prepped["H"]
    assert prepped["D_img"] == D_img
    stream_dt = jnp.dtype(prepped["w_t"].dtype)     # bf16 by default
    out_dt = stream_dt if out_dtype is None else jnp.dtype(out_dtype)
    n_pos_pad = prepped["pos_tab"].shape[0]
    # NOTE: H should be a multiple of 128 (ideally 256 on v6e/v7x) for lane-dense
    # stores and clean MXU tiling; real UNITER H=768/1024 qualifies.

    # --- row-tile selection ---------------------------------------------------
    # bf16 streams want row tiles that are multiples of the native 16-row tiling.
    min_itemsize = min(stream_dt.itemsize, jnp.dtype(out_dt).itemsize)
    ra = 8 if min_itemsize >= 4 else 16                       # row alignment
    N = B * L
    n_al = -(-N // ra) * ra
    TL = -(-int(min(tile_rows, n_al)) // ra) * ra

    cdt_b = stream_dt.itemsize
    out_b = jnp.dtype(out_dt).itemsize
    n_param_bufs = 1 if single_buffer_params else 2

    def working_set(tl):
        # double-buffered row streams (feat, meta, type, out)
        stream = 2 * tl * (D_img * cdt_b + 2 * 4 + H * cdt_b + H * out_b)
        # resident params (weight, slab, pos table)
        resident = n_param_bufs * (D_img * H * cdt_b + 8 * H * 4
                                   + n_pos_pad * H * cdt_b)
        # in-kernel f32 temporaries (matmul result, LN intermediates) + one-hot
        temps = 6 * tl * H * 4 + tl * n_pos_pad * cdt_b
        return stream + resident + temps

    VMEM_BUDGET = 40 * 2**20          # conservative: fits v7x's 64 MiB VMEM
    while TL > ra and working_set(TL) > VMEM_BUDGET:
        TL = max(ra, ((TL // 2) + ra - 1) // ra * ra)

    # keep >= 2 grid steps when there is enough work (two TensorCores on v7x)
    if n_al // TL < 2 and n_al >= 2 * ra:
        TL = max(ra, -(-(n_al // 2) // ra) * ra)

    N_pad = -(-N // TL) * TL
    n_steps = N_pad // TL

    # --- input staging (bf16 streaming by default) -----------------------------
    feat2 = img_feat.reshape(N, D_img).astype(stream_dt)
    type2 = type_embeddings.reshape(N, H).astype(stream_dt)
    if img_masks is None:
        img_masks = jnp.zeros((B, L), jnp.int32)
    # clamp pos ids so out-of-range ids behave like jnp.take's clamping
    pos_ids = jnp.clip(img_pos_ids.reshape(N).astype(jnp.int32),
                       0, prepped["n_pos"] - 1)
    meta2 = jnp.stack([pos_ids, img_masks.reshape(N).astype(jnp.int32)],
                      axis=-1)                                   # (N, 2) int32

    def pad_rows(a):
        if a.shape[0] == N_pad:
            return a
        return jnp.pad(a, ((0, N_pad - a.shape[0]),) + ((0, 0),) * (a.ndim - 1))

    feat2, type2, meta2 = pad_rows(feat2), pad_rows(type2), pad_rows(meta2)

    vmem_limit = int(min(48 * 2**20, max(24 * 2**20, int(1.3 * working_set(TL)))))

    row = lambda c: pl.BlockSpec((TL, c), lambda i: (i, 0))
    if single_buffer_params:
        # grid-invariant params: single buffer (frees VMEM headroom, esp. on v7x)
        full = lambda r, c: pl.BlockSpec((r, c), lambda i: (0, 0),
                                         pipeline_mode=pl.Buffered(1))
    else:
        full = lambda r, c: pl.BlockSpec((r, c), lambda i: (0, 0))

    out = pl.pallas_call(
        uniter_kernel,
        out_shape=jax.ShapeDtypeStruct((N_pad, H), out_dt),
        grid_spec=pltpu.PrefetchScalarGridSpec(
            num_scalar_prefetch=0,
            grid=(n_steps,),
            in_specs=[
                row(D_img),                 # img_feat rows (stream dtype)
                row(2),                     # (pos_id, mask) per row, int32
                row(H),                     # type embeddings rows (stream dtype)
                full(D_img, H),             # linear weight (pre-transposed)
                full(8, H),                 # bias/LN/mask-proj slab (f32)
                full(n_pos_pad, H),         # padded position table
            ],
            out_specs=pl.BlockSpec((TL, H), lambda i: (i, 0)),
        ),
        compiler_params=pltpu.CompilerParams(
            dimension_semantics=("parallel",),
            vmem_limit_bytes=vmem_limit),
    )(feat2, meta2, type2, prepped["w_t"], prepped["slab"], prepped["pos_tab"])

    return out[:N].reshape(B, L, H)


# -----------------------------------------------------------------------------
# Pure-JAX reference
# -----------------------------------------------------------------------------
def reference(img_feat, img_pos_ids, type_embeddings, img_masks, params):
    feat = img_feat
    if img_masks is not None:
        feat = feat + img_masks[..., None].astype(jnp.float32) * params["mask_emb"][1]
    x = feat @ params["img_linear_w"].T + params["img_linear_b"]
    x = _layernorm(x, params["img_ln_g"], params["img_ln_b"])
    pos = jnp.take(params["pos_table"], img_pos_ids, axis=0)
    x = x + pos + type_embeddings
    x = _layernorm(x, params["ln_g"], params["ln_b"])
    return x
    # TODO(synk): training-mode dropout (RNG) is not implemented; eval mode only.


if __name__ == "__main__":
    B, L, D_IMG, H = 2, 8, 128, 128   # small shapes, lane-dense hidden dim

    key = jax.random.PRNGKey(0)
    ks = jax.random.split(key, 8)

    params = {
        "img_linear_w": jax.random.normal(ks[0], (H, D_IMG), jnp.float32) * 0.05,
        "img_linear_b": jax.random.normal(ks[1], (H,), jnp.float32) * 0.01,
        "img_ln_g": jnp.ones((H,), jnp.float32) + 0.1 * jax.random.normal(ks[2], (H,)),
        "img_ln_b": 0.1 * jax.random.normal(ks[3], (H,)),
        "ln_g": jnp.ones((H,), jnp.float32) + 0.1 * jax.random.normal(ks[4], (H,)),
        "ln_b": 0.1 * jax.random.normal(ks[5], (H,)),
        "mask_emb": jax.random.normal(ks[6], (2, D_IMG), jnp.float32) * 0.05,
        "pos_table": make_pos_embed(10, H),
    }
    # fc_v and pos_layer_norm exist in __init__ but are unused in forward.

    ki = jax.random.split(ks[7], 4)
    img_feat = jax.random.normal(ki[0], (B, L, D_IMG), jnp.float32)
    img_pos_ids = jax.random.randint(ki[1], (B, L), 0, 10, jnp.int32)
    type_embeddings = jax.random.normal(ki[2], (B, L, H), jnp.float32)
    img_masks = jax.random.randint(ki[3], (B, L), 0, 2, jnp.int32)

    ref = reference(img_feat, img_pos_ids, type_embeddings, img_masks, params)

    prepped_f32 = prepare_params(params, compute_dtype=jnp.float32)
    prepped_bf16 = prepare_params(params, compute_dtype=jnp.bfloat16)

    # 1) f32 compute path: tight check of the fused logic (mask fold included).
    #    Also probes whether single-buffered params (pl.Buffered(1)) lower on
    #    this build; falls back to default buffering if not.
    single_buf = True
    try:
        out_f32 = jax.block_until_ready(
            uniter_r2p1d_embeddings(img_feat, img_pos_ids, type_embeddings,
                                    img_masks, prepped_f32,
                                    out_dtype=jnp.float32,
                                    single_buffer_params=True))
    except Exception:
        # TODO(synk): pl.Buffered(1) single-buffering rejected on this jax/libtpu
        # build; falling back to default double-buffered resident params.
        single_buf = False
        out_f32 = jax.block_until_ready(
            uniter_r2p1d_embeddings(img_feat, img_pos_ids, type_embeddings,
                                    img_masks, prepped_f32,
                                    out_dtype=jnp.float32,
                                    single_buffer_params=False))
    assert out_f32.shape == (B, L, H)
    np.testing.assert_allclose(np.asarray(out_f32), np.asarray(ref),
                               rtol=1e-3, atol=1e-3)

    # 2) bf16 streaming path (default performance configuration): loose check
    out_bf16 = jax.block_until_ready(
        uniter_r2p1d_embeddings(img_feat, img_pos_ids, type_embeddings,
                                img_masks, prepped_bf16,
                                single_buffer_params=single_buf))
    assert out_bf16.shape == (B, L, H)
    assert out_bf16.dtype == jnp.bfloat16
    np.testing.assert_allclose(np.asarray(out_bf16.astype(jnp.float32)),
                               np.asarray(ref), rtol=5e-2, atol=5e-2)

    # 3) img_masks=None path
    out_nm = jax.block_until_ready(
        uniter_r2p1d_embeddings(img_feat, img_pos_ids, type_embeddings, None,
                                prepped_f32, out_dtype=jnp.float32,
                                single_buffer_params=single_buf))
    ref_nm = reference(img_feat, img_pos_ids, type_embeddings, None, params)
    np.testing.assert_allclose(np.asarray(out_nm), np.asarray(ref_nm),
                               rtol=1e-3, atol=1e-3)

    # 4) ragged row count (exercises the padded final tile)
    B2, L2 = 3, 7
    kj = jax.random.split(ki[3], 4)
    feat_r = jax.random.normal(kj[0], (B2, L2, D_IMG), jnp.float32)
    pos_r = jax.random.randint(kj[1], (B2, L2), 0, 10, jnp.int32)
    type_r = jax.random.normal(kj[2], (B2, L2, H), jnp.float32)
    mask_r = jax.random.randint(kj[3], (B2, L2), 0, 2, jnp.int32)
    out_r = jax.block_until_ready(
        uniter_r2p1d_embeddings(feat_r, pos_r, type_r, mask_r, prepped_f32,
                                out_dtype=jnp.float32,
                                single_buffer_params=single_buf))
    ref_r = reference(feat_r, pos_r, type_r, mask_r, params)
    np.testing.assert_allclose(np.asarray(out_r), np.asarray(ref_r),
                               rtol=1e-3, atol=1e-3)

    print("KERNEL_OK")
</pallas_src>

<mosaic_0001>
module attributes {stable_mosaic.version = 11 : i64} {
  func.func @uniter_kernel(%arg0: i32, %arg1: memref<8x128xf32, #tpu.memory_space<vmem>>, %arg2: memref<8x2xi32, #tpu.memory_space<vmem>>, %arg3: memref<8x128xf32, #tpu.memory_space<vmem>>, %arg4: memref<128x128xf32, #tpu.memory_space<vmem>>, %arg5: memref<8x128xf32, #tpu.memory_space<vmem>>, %arg6: memref<16x128xf32, #tpu.memory_space<vmem>>, %arg7: memref<8x128xf32, #tpu.memory_space<vmem>>) attributes {dimension_semantics = [#tpu.dimension_semantics<parallel>], iteration_bounds = array<i64: 2>, scalar_prefetch = 0 : i64, scratch_operands = 0 : i64, tpu.core_type = #tpu.core_type<tc>, window_params = [{transform_indices = @transform_0, window_bounds = array<i64: 8, 128>}, {transform_indices = @transform_1, window_bounds = array<i64: 8, 2>}, {transform_indices = @transform_2, window_bounds = array<i64: 8, 128>}, {pipeline_mode = #tpu.pipeline_mode<synchronous>, transform_indices = @transform_3, window_bounds = array<i64: 128, 128>}, {pipeline_mode = #tpu.pipeline_mode<synchronous>, transform_indices = @transform_4, window_bounds = array<i64: 8, 128>}, {pipeline_mode = #tpu.pipeline_mode<synchronous>, transform_indices = @transform_5, window_bounds = array<i64: 16, 128>}, {transform_indices = @transform_6, window_bounds = array<i64: 8, 128>}]} {
    %c0 = arith.constant 0 : index
    %c0_0 = arith.constant 0 : index
    %0 = vector.load %arg2[%c0, %c0_0] : memref<8x2xi32, #tpu.memory_space<vmem>>, vector<8x1xi32>
    %c0_1 = arith.constant 0 : index
    %c1 = arith.constant 1 : index
    %1 = vector.load %arg2[%c0_1, %c1] : memref<8x2xi32, #tpu.memory_space<vmem>>, vector<8x1xi32>
    %2 = arith.sitofp %1 : vector<8x1xi32> to vector<8x1xf32>
    %c0_2 = arith.constant 0 : index
    %c0_3 = arith.constant 0 : index
    %3 = vector.load %arg1[%c0_2, %c0_3] : memref<8x128xf32, #tpu.memory_space<vmem>>, vector<8x128xf32>
    %c0_4 = arith.constant 0 : index
    %c0_5 = arith.constant 0 : index
    %4 = vector.load %arg4[%c0_4, %c0_5] : memref<128x128xf32, #tpu.memory_space<vmem>>, vector<128x128xf32>
    %cst = arith.constant dense<0.000000e+00> : vector<8x128xf32>
    %5 = tpu.matmul %3, %4, %cst {dimension_numbers = #tpu.dot_dimension_numbers<[1], [0], [0], [1], [0, 0, 1, 1], [], []>} : vector<8x128xf32>, vector<128x128xf32>, vector<8x128xf32> -> vector<8x128xf32>
    %c0_6 = arith.constant 0 : index
    %c0_7 = arith.constant 0 : index
    %6 = vector.load %arg5[%c0_6, %c0_7] : memref<8x128xf32, #tpu.memory_space<vmem>>, vector<1x128xf32>
    %7 = vector.broadcast %6 : vector<1x128xf32> to vector<8x128xf32>
    %8 = arith.addf %5, %7 : vector<8x128xf32>
    %c5 = arith.constant 5 : index
    %c0_8 = arith.constant 0 : index
    %9 = vector.load %arg5[%c5, %c0_8] : memref<8x128xf32, #tpu.memory_space<vmem>>, vector<1x128xf32>
    %10 = vector.broadcast %2 : vector<8x1xf32> to vector<8x128xf32>
    %11 = vector.broadcast %9 : vector<1x128xf32> to vector<8x128xf32>
    %12 = arith.mulf %10, %11 : vector<8x128xf32>
    %13 = arith.addf %8, %12 : vector<8x128xf32>
    %c1_9 = arith.constant 1 : index
    %c0_10 = arith.constant 0 : index
    %14 = vector.load %arg5[%c1_9, %c0_10] : memref<8x128xf32, #tpu.memory_space<vmem>>, vector<1x128xf32>
    %c2 = arith.constant 2 : index
    %c0_11 = arith.constant 0 : index
    %15 = vector.load %arg5[%c2, %c0_11] : memref<8x128xf32, #tpu.memory_space<vmem>>, vector<1x128xf32>
    %cst_12 = arith.constant dense<0.000000e+00> : vector<8xf32>
    %16 = vector.multi_reduction <add>, %13, %cst_12 [1] : vector<8x128xf32> to vector<8xf32>
    %17 = vector.shape_cast %16 : vector<8xf32> to vector<8x1xf32>
    %cst_13 = arith.constant 1.280000e+02 : f32
    %18 = vector.broadcast %cst_13 : f32 to vector<8x1xf32>
    %19 = arith.divf %17, %18 : vector<8x1xf32>
    %20 = vector.broadcast %19 : vector<8x1xf32> to vector<8x128xf32>
    %21 = arith.subf %13, %20 : vector<8x128xf32>
    %22 = arith.mulf %21, %21 : vector<8x128xf32>
    %cst_14 = arith.constant dense<0.000000e+00> : vector<8xf32>
    %23 = vector.multi_reduction <add>, %22, %cst_14 [1] : vector<8x128xf32> to vector<8xf32>
    %24 = vector.shape_cast %23 : vector<8xf32> to vector<8x1xf32>
    %cst_15 = arith.constant 1.280000e+02 : f32
    %25 = vector.broadcast %cst_15 : f32 to vector<8x1xf32>
    %26 = arith.divf %24, %25 : vector<8x1xf32>
    %cst_16 = arith.constant 9.99999996E-13 : f32
    %27 = vector.broadcast %cst_16 : f32 to vector<8x1xf32>
    %28 = arith.addf %26, %27 : vector<8x1xf32>
    %29 = math.rsqrt %28 : vector<8x1xf32>
    %30 = vector.broadcast %29 : vector<8x1xf32> to vector<8x128xf32>
    %31 = arith.mulf %21, %30 : vector<8x128xf32>
    %32 = vector.broadcast %14 : vector<1x128xf32> to vector<8x128xf32>
    %33 = arith.mulf %31, %32 : vector<8x128xf32>
    %34 = vector.broadcast %15 : vector<1x128xf32> to vector<8x128xf32>
    %35 = arith.addf %33, %34 : vector<8x128xf32>
    %36 = tpu.iota {dimensions = array<i32: 1>} : vector<8x16xi32>
    %37 = vector.broadcast %0 : vector<8x1xi32> to vector<8x16xi32>
    %38 = arith.cmpi eq, %37, %36 : vector<8x16xi32>
    %39 = arith.extui %38 : vector<8x16xi1> to vector<8x16xi32>
    %40 = arith.sitofp %39 : vector<8x16xi32> to vector<8x16xf32>
    %c0_17 = arith.constant 0 : index
    %c0_18 = arith.constant 0 : index
    %41 = vector.load %arg6[%c0_17, %c0_18] : memref<16x128xf32, #tpu.memory_space<vmem>>, vector<16x128xf32>
    %cst_19 = arith.constant dense<0.000000e+00> : vector<8x128xf32>
    %42 = tpu.matmul %40, %41, %cst_19 {dimension_numbers = #tpu.dot_dimension_numbers<[1], [0], [0], [1], [0, 0, 1, 1], [], []>} : vector<8x16xf32>, vector<16x128xf32>, vector<8x128xf32> -> vector<8x128xf32>
    %43 = arith.addf %35, %42 : vector<8x128xf32>
    %c0_20 = arith.constant 0 : index
    %c0_21 = arith.constant 0 : index
    %44 = vector.load %arg3[%c0_20, %c0_21] : memref<8x128xf32, #tpu.memory_space<vmem>>, vector<8x128xf32>
    %45 = arith.addf %43, %44 : vector<8x128xf32>
    %c3 = arith.constant 3 : index
    %c0_22 = arith.constant 0 : index
    %46 = vector.load %arg5[%c3, %c0_22] : memref<8x128xf32, #tpu.memory_space<vmem>>, vector<1x128xf32>
    %c4 = arith.constant 4 : index
    %c0_23 = arith.constant 0 : index
    %47 = vector.load %arg5[%c4, %c0_23] : memref<8x128xf32, #tpu.memory_space<vmem>>, vector<1x128xf32>
    %cst_24 = arith.constant dense<0.000000e+00> : vector<8xf32>
    %48 = vector.multi_reduction <add>, %45, %cst_24 [1] : vector<8x128xf32> to vector<8xf32>
    %49 = vector.shape_cast %48 : vector<8xf32> to vector<8x1xf32>
    %cst_25 = arith.constant 1.280000e+02 : f32
    %50 = vector.broadcast %cst_25 : f32 to vector<8x1xf32>
    %51 = arith.divf %49, %50 : vector<8x1xf32>
    %52 = vector.broadcast %51 : vector<8x1xf32> to vector<8x128xf32>
    %53 = arith.subf %45, %52 : vector<8x128xf32>
    %54 = arith.mulf %53, %53 : vector<8x128xf32>
    %cst_26 = arith.constant dense<0.000000e+00> : vector<8xf32>
    %55 = vector.multi_reduction <add>, %54, %cst_26 [1] : vector<8x128xf32> to vector<8xf32>
    %56 = vector.shape_cast %55 : vector<8xf32> to vector<8x1xf32>
    %cst_27 = arith.constant 1.280000e+02 : f32
    %57 = vector.broadcast %cst_27 : f32 to vector<8x1xf32>
    %58 = arith.divf %56, %57 : vector<8x1xf32>
    %cst_28 = arith.constant 9.99999996E-13 : f32
    %59 = vector.broadcast %cst_28 : f32 to vector<8x1xf32>
    %60 = arith.addf %58, %59 : vector<8x1xf32>
    %61 = math.rsqrt %60 : vector<8x1xf32>
    %62 = vector.broadcast %61 : vector<8x1xf32> to vector<8x128xf32>
    %63 = arith.mulf %53, %62 : vector<8x128xf32>
    %64 = vector.broadcast %46 : vector<1x128xf32> to vector<8x128xf32>
    %65 = arith.mulf %63, %64 : vector<8x128xf32>
    %66 = vector.broadcast %47 : vector<1x128xf32> to vector<8x128xf32>
    %67 = arith.addf %65, %66 : vector<8x128xf32>
    %c0_29 = arith.constant 0 : index
    %c0_30 = arith.constant 0 : index
    %68 = vector.load %arg7[%c0_29, %c0_30] : memref<8x128xf32, #tpu.memory_space<vmem>>, vector<8x128xf32>
    tpu.vector_store %arg7[%c0_29, %c0_30], %67 {strides = array<i32>} : memref<8x128xf32, #tpu.memory_space<vmem>>, vector<8x128xf32>,
    return
  }
  func.func @transform_0(%arg0: i32) -> (i32, i32) {
    %c0_i32 = arith.constant 0 : i32
    %c0_i32_0 = arith.constant 0 : i32
    return %arg0, %c0_i32 : i32, i32
  }
  func.func @transform_1(%arg0: i32) -> (i32, i32) {
    %c0_i32 = arith.constant 0 : i32
    %c0_i32_0 = arith.constant 0 : i32
    return %arg0, %c0_i32 : i32, i32
  }
  func.func @transform_2(%arg0: i32) -> (i32, i32) {
    %c0_i32 = arith.constant 0 : i32
    %c0_i32_0 = arith.constant 0 : i32
    return %arg0, %c0_i32 : i32, i32
  }
  func.func @transform_3(%arg0: i32) -> (i32, i32) {
    %c0_i32 = arith.constant 0 : i32
    %c0_i32_0 = arith.constant 0 : i32
    %c0_i32_1 = arith.constant 0 : i32
    return %c0_i32, %c0_i32_0 : i32, i32
  }
  func.func @transform_4(%arg0: i32) -> (i32, i32) {
    %c0_i32 = arith.constant 0 : i32
    %c0_i32_0 = arith.constant 0 : i32
    %c0_i32_1 = arith.constant 0 : i32
    return %c0_i32, %c0_i32_0 : i32, i32
  }
  func.func @transform_5(%arg0: i32) -> (i32, i32) {
    %c0_i32 = arith.constant 0 : i32
    %c0_i32_0 = arith.constant 0 : i32
    %c0_i32_1 = arith.constant 0 : i32
    return %c0_i32, %c0_i32_0 : i32, i32
  }
  func.func @transform_6(%arg0: i32) -> (i32, i32) {
    %c0_i32 = arith.constant 0 : i32
    %c0_i32_0 = arith.constant 0 : i32
    return %arg0, %c0_i32 : i32, i32
  }
}

module attributes {stable_mosaic.version = 11 : i64} {
  func.func @uniter_kernel(%arg0: i32, %arg1: memref<8x128xf32, #tpu.memory_space<vmem>>, %arg2: memref<8x2xi32, #tpu.memory_space<vmem>>, %arg3: memref<8x128xf32, #tpu.memory_space<vmem>>, %arg4: memref<128x128xf32, #tpu.memory_space<vmem>>, %arg5: memref<8x128xf32, #tpu.memory_space<vmem>>, %arg6: memref<16x128xf32, #tpu.memory_space<vmem>>, %arg7: memref<8x128xf32, #tpu.memory_space<vmem>>) attributes {dimension_semantics = [#tpu.dimension_semantics<parallel>], iteration_bounds = array<i64: 2>, scalar_prefetch = 0 : i64, scratch_operands = 0 : i64, tpu.core_type = #tpu.core_type<tc>, window_params = [{transform_indices = @transform_0, window_bounds = array<i64: 8, 128>}, {transform_indices = @transform_1, window_bounds = array<i64: 8, 2>}, {transform_indices = @transform_2, window_bounds = array<i64: 8, 128>}, {pipeline_mode = #tpu.pipeline_mode<synchronous>, transform_indices = @transform_3, window_bounds = array<i64: 128, 128>}, {pipeline_mode = #tpu.pipeline_mode<synchronous>, transform_indices = @transform_4, window_bounds = array<i64: 8, 128>}, {pipeline_mode = #tpu.pipeline_mode<synchronous>, transform_indices = @transform_5, window_bounds = array<i64: 16, 128>}, {transform_indices = @transform_6, window_bounds = array<i64: 8, 128>}]} {
    %c0 = arith.constant 0 : index
    %c0_0 = arith.constant 0 : index
    %0 = vector.load %arg2[%c0, %c0_0] : memref<8x2xi32, #tpu.memory_space<vmem>>, vector<8x1xi32>
    %c0_1 = arith.constant 0 : index
    %c1 = arith.constant 1 : index
    %1 = vector.load %arg2[%c0_1, %c1] : memref<8x2xi32, #tpu.memory_space<vmem>>, vector<8x1xi32>
    %2 = arith.sitofp %1 : vector<8x1xi32> to vector<8x1xf32>
    %c0_2 = arith.constant 0 : index
    %c0_3 = arith.constant 0 : index
    %3 = vector.load %arg1[%c0_2, %c0_3] : memref<8x128xf32, #tpu.memory_space<vmem>>, vector<8x128xf32>
    %c0_4 = arith.constant 0 : index
    %c0_5 = arith.constant 0 : index
    %4 = vector.load %arg4[%c0_4, %c0_5] : memref<128x128xf32, #tpu.memory_space<vmem>>, vector<128x128xf32>
    %cst = arith.constant dense<0.000000e+00> : vector<8x128xf32>
    %5 = tpu.matmul %3, %4, %cst {dimension_numbers = #tpu.dot_dimension_numbers<[1], [0], [0], [1], [0, 0, 1, 1], [], []>} : vector<8x128xf32>, vector<128x128xf32>, vector<8x128xf32> -> vector<8x128xf32>
    %c0_6 = arith.constant 0 : index
    %c0_7 = arith.constant 0 : index
    %6 = vector.load %arg5[%c0_6, %c0_7] : memref<8x128xf32, #tpu.memory_space<vmem>>, vector<1x128xf32>
    %7 = vector.broadcast %6 : vector<1x128xf32> to vector<8x128xf32>
    %8 = arith.addf %5, %7 : vector<8x128xf32>
    %c5 = arith.constant 5 : index
    %c0_8 = arith.constant 0 : index
    %9 = vector.load %arg5[%c5, %c0_8] : memref<8x128xf32, #tpu.memory_space<vmem>>, vector<1x128xf32>
    %10 = vector.broadcast %2 : vector<8x1xf32> to vector<8x128xf32>
    %11 = vector.broadcast %9 : vector<1x128xf32> to vector<8x128xf32>
    %12 = arith.mulf %10, %11 : vector<8x128xf32>
    %13 = arith.addf %8, %12 : vector<8x128xf32>
    %c1_9 = arith.constant 1 : index
    %c0_10 = arith.constant 0 : index
    %14 = vector.load %arg5[%c1_9, %c0_10] : memref<8x128xf32, #tpu.memory_space<vmem>>, vector<1x128xf32>
    %c2 = arith.constant 2 : index
    %c0_11 = arith.constant 0 : index
    %15 = vector.load %arg5[%c2, %c0_11] : memref<8x128xf32, #tpu.memory_space<vmem>>, vector<1x128xf32>
    %cst_12 = arith.constant dense<0.000000e+00> : vector<8xf32>
    %16 = vector.multi_reduction <add>, %13, %cst_12 [1] : vector<8x128xf32> to vector<8xf32>
    %17 = vector.shape_cast %16 : vector<8xf32> to vector<8x1xf32>
    %cst_13 = arith.constant 1.280000e+02 : f32
    %18 = vector.broadcast %cst_13 : f32 to vector<8x1xf32>
    %19 = arith.divf %17, %18 : vector<8x1xf32>
    %20 = vector.broadcast %19 : vector<8x1xf32> to vector<8x128xf32>
    %21 = arith.subf %13, %20 : vector<8x128xf32>
    %22 = arith.mulf %21, %21 : vector<8x128xf32>
    %cst_14 = arith.constant dense<0.000000e+00> : vector<8xf32>
    %23 = vector.multi_reduction <add>, %22, %cst_14 [1] : vector<8x128xf32> to vector<8xf32>
    %24 = vector.shape_cast %23 : vector<8xf32> to vector<8x1xf32>
    %cst_15 = arith.constant 1.280000e+02 : f32
    %25 = vector.broadcast %cst_15 : f32 to vector<8x1xf32>
    %26 = arith.divf %24, %25 : vector<8x1xf32>
    %cst_16 = arith.constant 9.99999996E-13 : f32
    %27 = vector.broadcast %cst_16 : f32 to vector<8x1xf32>
    %28 = arith.addf %26, %27 : vector<8x1xf32>
    %29 = math.rsqrt %28 : vector<8x1xf32>
    %30 = vector.broadcast %29 : vector<8x1xf32> to vector<8x128xf32>
    %31 = arith.mulf %21, %30 : vector<8x128xf32>
    %32 = vector.broadcast %14 : vector<1x128xf32> to vector<8x128xf32>
    %33 = arith.mulf %31, %32 : vector<8x128xf32>
    %34 = vector.broadcast %15 : vector<1x128xf32> to vector<8x128xf32>
    %35 = arith.addf %33, %34 : vector<8x128xf32>
    %36 = tpu.iota {dimensions = array<i32: 1>} : vector<8x16xi32>
    %37 = vector.broadcast %0 : vector<8x1xi32> to vector<8x16xi32>
    %38 = arith.cmpi eq, %37, %36 : vector<8x16xi32>
    %39 = arith.extui %38 : vector<8x16xi1> to vector<8x16xi32>
    %40 = arith.sitofp %39 : vector<8x16xi32> to vector<8x16xf32>
    %c0_17 = arith.constant 0 : index
    %c0_18 = arith.constant 0 : index
    %41 = vector.load %arg6[%c0_17, %c0_18] : memref<16x128xf32, #tpu.memory_space<vmem>>, vector<16x128xf32>
    %cst_19 = arith.constant dense<0.000000e+00> : vector<8x128xf32>
    %42 = tpu.matmul %40, %41, %cst_19 {dimension_numbers = #tpu.dot_dimension_numbers<[1], [0], [0], [1], [0, 0, 1, 1], [], []>} : vector<8x16xf32>, vector<16x128xf32>, vector<8x128xf32> -> vector<8x128xf32>
    %43 = arith.addf %35, %42 : vector<8x128xf32>
    %c0_20 = arith.constant 0 : index
    %c0_21 = arith.constant 0 : index
    %44 = vector.load %arg3[%c0_20, %c0_21] : memref<8x128xf32, #tpu.memory_space<vmem>>, vector<8x128xf32>
    %45 = arith.addf %43, %44 : vector<8x128xf32>
    %c3 = arith.constant 3 : index
    %c0_22 = arith.constant 0 : index
    %46 = vector.load %arg5[%c3, %c0_22] : memref<8x128xf32, #tpu.memory_space<vmem>>, vector<1x128xf32>
    %c4 = arith.constant 4 : index
    %c0_23 = arith.constant 0 : index
    %47 = vector.load %arg5[%c4, %c0_23] : memref<8x128xf32, #tpu.memory_space<vmem>>, vector<1x128xf32>
    %cst_24 = arith.constant dense<0.000000e+00> : vector<8xf32>
    %48 = vector.multi_reduction <add>, %45, %cst_24 [1] : vector<8x128xf32> to vector<8xf32>
    %49 = vector.shape_cast %48 : vector<8xf32> to vector<8x1xf32>
    %cst_25 = arith.constant 1.280000e+02 : f32
    %50 = vector.broadcast %cst_25 : f32 to vector<8x1xf32>
    %51 = arith.divf %49, %50 : vector<8x1xf32>
    %52 = vector.broadcast %51 : vector<8x1xf32> to vector<8x128xf32>
    %53 = arith.subf %45, %52 : vector<8x128xf32>
    %54 = arith.mulf %53, %53 : vector<8x128xf32>
    %cst_26 = arith.constant dense<0.000000e+00> : vector<8xf32>
    %55 = vector.multi_reduction <add>, %54, %cst_26 [1] : vector<8x128xf32> to vector<8xf32>
    %56 = vector.shape_cast %55 : vector<8xf32> to vector<8x1xf32>
    %cst_27 = arith.constant 1.280000e+02 : f32
    %57 = vector.broadcast %cst_27 : f32 to vector<8x1xf32>
    %58 = arith.divf %56, %57 : vector<8x1xf32>
    %cst_28 = arith.constant 9.99999996E-13 : f32
    %59 = vector.broadcast %cst_28 : f32 to vector<8x1xf32>
    %60 = arith.addf %58, %59 : vector<8x1xf32>
    %61 = math.rsqrt %60 : vector<8x1xf32>
    %62 = vector.broadcast %61 : vector<8x1xf32> to vector<8x128xf32>
    %63 = arith.mulf %53, %62 : vector<8x128xf32>
    %64 = vector.broadcast %46 : vector<1x128xf32> to vector<8x128xf32>
    %65 = arith.mulf %63, %64 : vector<8x128xf32>
    %66 = vector.broadcast %47 : vector<1x128xf32> to vector<8x128xf32>
    %67 = arith.addf %65, %66 : vector<8x128xf32>
    %c0_29 = arith.constant 0 : index
    %c0_30 = arith.constant 0 : index
    %68 = vector.load %arg7[%c0_29, %c0_30] : memref<8x128xf32, #tpu.memory_space<vmem>>, vector<8x128xf32>
    tpu.vector_store %arg7[%c0_29, %c0_30], %67 {strides = array<i32>} : memref<8x128xf32, #tpu.memory_space<vmem>>, vector<8x128xf32>,
    return
  }
  func.func @transform_0(%arg0: i32) -> (i32, i32) {
    %c0_i32 = arith.constant 0 : i32
    %c0_i32_0 = arith.constant 0 : i32
    return %arg0, %c0_i32 : i32, i32
  }
  func.func @transform_1(%arg0: i32) -> (i32, i32) {
    %c0_i32 = arith.constant 0 : i32
    %c0_i32_0 = arith.constant 0 : i32
    return %arg0, %c0_i32 : i32, i32
  }
  func.func @transform_2(%arg0: i32) -> (i32, i32) {
    %c0_i32 = arith.constant 0 : i32
    %c0_i32_0 = arith.constant 0 : i32
    return %arg0, %c0_i32 : i32, i32
  }
  func.func @transform_3(%arg0: i32) -> (i32, i32) {
    %c0_i32 = arith.constant 0 : i32
    %c0_i32_0 = arith.constant 0 : i32
    %c0_i32_1 = arith.constant 0 : i32
    return %c0_i32, %c0_i32_0 : i32, i32
  }
  func.func @transform_4(%arg0: i32) -> (i32, i32) {
    %c0_i32 = arith.constant 0 : i32
    %c0_i32_0 = arith.constant 0 : i32
    %c0_i32_1 = arith.constant 0 : i32
    return %c0_i32, %c0_i32_0 : i32, i32
  }
  func.func @transform_5(%arg0: i32) -> (i32, i32) {
    %c0_i32 = arith.constant 0 : i32
    %c0_i32_0 = arith.constant 0 : i32
    %c0_i32_1 = arith.constant 0 : i32
    return %c0_i32, %c0_i32_0 : i32, i32
  }
  func.func @transform_6(%arg0: i32) -> (i32, i32) {
    %c0_i32 = arith.constant 0 : i32
    %c0_i32_0 = arith.constant 0 : i32
    return %arg0, %c0_i32 : i32, i32
  }
}

</mosaic_0001>

<bundles_post_ra>
// kernel: tpu_custom_call.1
= control target key start
LH: loop header
LB: loop body
LE: loop exit
PB: predicated region body
PF: predicated region fallthrough
CT: control target
= control target key end

     0   :  { %11 = vsyncpa [#allocation3], 0  ;;  %s1356_s0 = inlined_call_operand.vmem [shape: f32[16,128], index: 0, kind: input, shape index: {}]   ;;  %s1357_s1 = inlined_call_operand.vmem [shape: s32[16,2], index: 1, kind: input, shape index: {}]   ;;  %s1358_s2 = inlined_call_operand.hbm [shape: f32[16,128], index: 2, kind: input, shape index: {}]   ;;  %s1359_s3 = inlined_call_operand.hbm [shape: f32[128,128], index: 3, kind: input, shape index: {}]   ;;  %s1360_s4 = inlined_call_operand.hbm [shape: f32[8,128], index: 4, kind: input, shape index: {}]   ;;  %s1361_s5 = inlined_call_operand.vmem [shape: f32[16,128], index: 5, kind: input, shape index: {}]   ;;  %s1362_s6 = inlined_call_operand.hbm [shape: f32[16,128], index: 6, kind: output, shape index: {}]  }
   0x1   :  { %13 = vsyncpa [#allocation3 + $0x1], 0 }
   0x2   :  { %14 = vsyncpa [#allocation6], 0 }
   0x3   :  { %15 = vsyncpa [#allocation4], 0 }
   0x4   :  { %17 = vsyncpa [#allocation4 + $0x1], 0  ;;  %s1096_s21 = smov 0   ;;  %s1098_s22 = smov 0  }
   0x5   :  { %s1100_s23 = smov 0   ;;  %s1102_s24 = smov 0  }
   0x6 LB: > { %s1117_s25 = sadd.s32 4294967295, %s1048_s24   ;;  %s696_s26 = sadd.s32 4294967294, %s1048_s24   ;;  %s1048_s24 = sphi %s1102_s24, %s1382_s24   ;;  %s1044_s23 = sphi %s1100_s23, %s1381_s23   ;;  %s1040_s22 = sphi %s1098_s22, %s1380_s22   ;;  %s1036_s21 = sphi %s1096_s21, %s1379_s21  }
   0x7   : > { %p95_p0 = scmp.ne.s32.totalorder %s1040_s22, %s1036_s21  ;;  %p1363_p1 = scmp.eq.s32.totalorder %s1117_s25, 0 }
   0x8   : > { %p188_p3 = scmp.eq.s32.totalorder %s696_s26, 1  ;;  %p697_p5 = scmp.ge.s32.totalorder %s1048_s24, 1 }
   0x9   : > { %p1126_p4 = por %p1363_p1, %p95_p0  ;;  %p195_p7 = scmp.lt.s32.totalorder %s1048_s24, 3 }
   0xa   : > { %p1131_p6 = por %p188_p3, %p95_p0  ;;  %s1050_s30 = smov [#allocation5]  }
   0xb   : > { %s1366_s27 = scalar_select %p1126_p4, 1, 0 }
   0xc   : > { %s1367_s28 = scalar_select %p1131_p6, 1, 0 }
   0xd   : > { %p1136_p8 = pnand %p697_p5, %p195_p7  ;;  %s207_s7 = sshll.u32 %s1050_s30, 4  ;;  %s1140_s7 = int_to_ptr.vmem [resolvable:$true] %s207_s7 }
   0xe   : > { %s1051_s9 = smov [#allocation7]   ;;  %s892_s13 = scalar_lea.hbm %s1359_s3, 2048 }
   0xf   : > { %p823_p9 = pneg %p1136_p8  ;;  %s221_s10 = sshll.u32 %s1051_s9, 4  ;;  %s1151_s10 = int_to_ptr.vmem [resolvable:$true] %s221_s10 }
  0x10   : > { %p893_p12 = scmp.ne.s32.totalorder %s1359_s3, %s892_s13  ;;  %p899_p5 = scmp.lt.u32.totalorder %s892_s13, %s1359_s3 }
  0x11   : > { %p1147_p11 = pnand %p823_p9, %p1363_p1 }
  0x13   : > { %p894_p13 = pneg %p1147_p11 }
  0x15   : > { %p895_p0 = pnand %p894_p13, %p893_p12 }
  0x17   : > { %p896_p3 = pneg %p895_p0 }
  0x19   : > { %p901_p7 = pnand %p899_p5, %p896_p3 }
  0x1b   : > { %904 = shalt.err (!%p901_p7)
}
  0x1c   : > { %s905_s18 = scalar_lea.vmem %s1140_s7, 2048  ;;  %p913_p2 = scmp.lt.s32.totalorder %s1140_s7, %s1140_s7 }
  0x1d   : > { %p906_p9 = scmp.ne.s32.totalorder %s1140_s7, %s905_s18  ;;  %p914_p12 = scmp.lt.s32.totalorder %s905_s18, %s905_s18 }
  0x1f   : > { %p908_p10 = pnand %p906_p9, %p894_p13  ;;  %p915_p0 = por %p914_p12, %p913_p2 }
  0x21   : > { %p909_p1 = pneg %p908_p10 }
  0x23   : > { %p916_p6 = pnand %p915_p0, %p909_p1 }
  0x25   : > { %919 = shalt.err (!%p916_p6)
}
  0x26   : > { %s1052_s19 = smov 128   ;;  %s1053_s20 = smov 8  }
  0x27   : > { %826 = dma.hbm_to_vmem [thread:$0]  (!%p1147_p11), %s1359_s3, 2048, %s1140_s7, [#allocation6], %s1052_s19, %s1052_s19, %s1053_s20  }
  0x28   : > { %s920_s12 = scalar_lea.hbm %s1360_s4, 128 }
  0x29   : > { %p921_p2 = scmp.ne.s32.totalorder %s1360_s4, %s920_s12  ;;  %p927_p10 = scmp.lt.u32.totalorder %s920_s12, %s1360_s4 }
  0x2b   : > { %p923_p1 = pnand %p921_p2, %p894_p13 }
  0x2d   : > { %p924_p6 = pneg %p923_p1 }
  0x2f   : > { %p929_p3 = pnand %p927_p10, %p924_p6 }
  0x31   : > { %932 = shalt.err (!%p929_p3)
}
  0x32   : > { %s933_s7 = scalar_lea.vmem %s1151_s10, 128  ;;  %p941_p12 = scmp.lt.s32.totalorder %s1151_s10, %s1151_s10 }
  0x33   : > { %p934_p5 = scmp.ne.s32.totalorder %s1151_s10, %s933_s7  ;;  %p942_p0 = scmp.lt.s32.totalorder %s933_s7, %s933_s7 }
  0x35   : > { %p936_p7 = pnand %p934_p5, %p894_p13  ;;  %p943_p2 = por %p942_p0, %p941_p12 }
  0x37   : > { %p937_p9 = pneg %p936_p7 }
  0x39   : > { %p944_p1 = pnand %p943_p2, %p937_p9 }
  0x3b   : > { %947 = shalt.err (!%p944_p1)
}
  0x3c   : > { %829 = dma.hbm_to_vmem [thread:$0]  (!%p1147_p11), %s1360_s4, 128, %s1151_s10, [#allocation6]  }
  0x3d   : > { %s1206_s19 = sadd.s32 1, %s1048_s24   ;;  %s82_s8 = sadd.s32 1, %s1044_s23 }
  0x3e   : > { %s79_s20 = ssub.s32 %s1048_s24, %s1206_s19  ;;  %p89_p13 = scmp.ne.s32.totalorder %s1044_s23, %s1040_s22 }
  0x3f   : > { %p80_p6 = scmp.eq.s32.totalorder %s79_s20, 0  ;;  %p90_p10 = scmp.eq.s32.totalorder %s1048_s24, 0 }
  0x40   : > { %p1370_p3 = scmp.eq.s32.totalorder %s1117_s25, 1  ;;  %p840_p7 = scmp.lt.s32.totalorder %s1048_s24, 2 }
  0x41   : > { %s1222_s30 = scalar_select %p80_p6, %s1044_s23, %s82_s8  }
  0x42   : > { %p1216_p5 = por %p1370_p3, %p89_p13  ;;  %p91_p9 = por %p90_p10, %p89_p13 }
  0x43   : > { %s249_s9 = sand.u32 1, %s1044_s23   ;;  %s702_s10 = sshll.u32 %s1048_s24, 7 }
  0x44   : > { %s1371_s26 = scalar_select %p1216_p5, 1, 0 }
  0x45   : > { %s701_s11 = sshll.u32 %s249_s9, 3  ;;  %s1229_s14 = scalar_lea.hbm %s1358_s2, %s702_s10 }
  0x46   : > { %s253_s15 = scalar_lea.vmem [#allocation2], %s701_s11  ;;  %p1233_p11 = pnand %p840_p7, %p91_p9 }
  0x47   : > { %s260_s16 = sshll.u32 %s253_s15, 4  ;;  %s250_s17 = scalar_lea.sflag [#allocation3], %s249_s9  ;;  %s1231_s16 = int_to_ptr.vmem [resolvable:$true] %s260_s16 }
  0x48   : > { %s948_s18 = scalar_lea.hbm %s1229_s14, 128  ;;  %p950_p0 = pneg %p1233_p11 }
  0x49   : > { %p949_p12 = scmp.ne.s32.totalorder %s1229_s14, %s948_s18  ;;  %s953_s11 = scalar_lea.hbm %s1358_s2, 256 }
  0x4a   : > { %p954_p13 = scmp.lt.u32.totalorder %s1229_s14, %s1358_s2  ;;  %p955_p6 = scmp.lt.u32.totalorder %s953_s11, %s948_s18 }
  0x4b   : > { %p951_p2 = pnand %p950_p0, %p949_p12  ;;  %p957_p3 = scmp.lt.u32.totalorder %s948_s18, %s1229_s14 }
  0x4c   : > { %p956_p10 = por %p955_p6, %p954_p13 }
  0x4d   : > { %p952_p1 = pneg %p951_p2 }
  0x4e   : > { %p958_p7 = por %p957_p3, %p956_p10 }
  0x50   : > { %p959_p9 = pnand %p958_p7, %p952_p1 }
  0x52   : > { %962 = shalt.err (!%p959_p9)
}
  0x53   : > { %s963_s9 = scalar_lea.vmem %s1231_s16, 128  ;;  %s1054_s13 = smov [#allocation2]  }
  0x54   : > { %p964_p12 = scmp.ne.s32.totalorder %s1231_s16, %s963_s9  ;;  %s968_s15 = sshll.u32 %s1054_s13, 4  ;;  %s969_s15 = int_to_ptr.vmem [resolvable:$false] %s968_s15 }
  0x55   : > { %s970_s8 = scalar_lea.vmem %s969_s15, 256  ;;  %p971_p4 = scmp.lt.s32.totalorder %s1231_s16, %s969_s15 }
  0x56   : > { %p966_p2 = pnand %p964_p12, %p950_p0  ;;  %p972_p13 = scmp.lt.s32.totalorder %s970_s8, %s963_s9 }
  0x58   : > { %p967_p5 = pneg %p966_p2  ;;  %p973_p6 = por %p972_p13, %p971_p4 }
  0x5a   : > { %p974_p10 = pnand %p973_p6, %p967_p5 }
  0x5c   : > { %977 = shalt.err (!%p974_p10)
}
  0x5d   : > { %833 = dma.hbm_to_vmem [thread:$0]  (!%p1233_p11), %s1229_s14, 128, %s1231_s16, %s250_s17  }
  0x5e   : > { %269 = sbr.rel (%p1136_p8) target bundleno = 996 (0x3e4), region = 44  ;;  %s1265_s18 = sand.u32 (!%p1136_p8), 1, %s1040_s22  }
  0x5f   : > { %s704_s20 = sshll.u32 (!%p1136_p8), %s1265_s18, 3  ;;  %s272_s11 = scalar_lea.sflag (!%p1136_p8), [#allocation3], %s1265_s18 }
  0x60   : > { %s1271_s10 = scalar_lea.vmem (!%p1136_p8), [#allocation2], %s704_s20  ;;  %p1373_p4 = scmp.ne.s32.totalorder (!%p1136_p8), %s1366_s27, 0 }
  0x65   : > { %1023 = dma.done.wait (%p1373_p4), %s272_s11, 128  }
  0x66   : > { %1025 = vsyncadd (%p1373_p4), %s272_s11, 4294967168  ;;  %p1374_p5 = scmp.eq.s32.totalorder %s1117_s25, 0 }
  0x68   : > { %1027 = dma.done.wait (%p1374_p5), [#allocation6], 2176   ;;  %p1375_p8 = pmov %p1374_p5 }
  0x69   : > { %p320_p11 = scmp.lt.s32.totalorder %s1117_s25, 1  ;;  %v1055_v0 = vmov 0.0|0.0   ;;  %vm1056_vm0 = vmmov 0   ;;  %v1057_v1 = vmov 0.0   ;;  %v1058_v2 = vmov 0   ;;  %v331_v3 = vld [vmem:[#allocation5] sm:$0xff] }
  0x6a   : > { %1029 = vsyncadd (%p1375_p8), [#allocation6], 4294965120  ;;  %784 = vmatprep.subr.bf16.mxu0 %v1055_v0  ;;  %774 = vmatprep.mubr.msk.f32.mxu0 %vm1056_vm0, %v1057_v1  ;;  %v332_v4 = vld [vmem:[#allocation5 + $0x8] sm:$0xff]  ;;  %v333_v5 = vld [vmem:[#allocation5 + $0x10] sm:$0xff]  ;;  %v1059_v19 = vmov 1   ;;  %v458_v34 = vlaneseq  ;;  %vm468_vm1 = vcmask 130048  }
  0x6b   : > { %885 = vset.pattern.permute.xlu0 %v1058_v2  ;;  %808 = vmatprep.subr.bf16.mxu1 %v1055_v0  ;;  %s1285_s27 = scalar_select %p320_p11, %s1117_s25, 1  ;;  %v785_v6 = vpack.c.bf16 %v332_v4, %v331_v3  ;;  %v334_v7 = vld [vmem:[#allocation5 + $0x18] sm:$0xff]  ;;  %v335_v9 = vld [vmem:[#allocation5 + $0x20] sm:$0xff]  ;;  %v336_v10 = vld [vmem:[#allocation5 + $0x28] sm:$0xff] }
  0x6c   : > { %781 = vmatprep.mubr.msk.f32.mxu1 %vm1056_vm0, %v1057_v1  ;;  %v788_v8 = vpack.c.bf16 %v334_v7, %v333_v5  ;;  %v466_v12 = vld [vmem:[%s1361_s5] sm:$0xff]  ;;  %v467_v13 = vld [vmem:[%s1361_s5 + $0x8] sm:$0xff]  ;;  %v791_v14 = vpack.c.bf16 %v336_v10, %v335_v9  ;;  %v339_v21 = vld [vmem:[#allocation5 + $0x40] sm:$0xff]  ;;  %v459_v35 = vand.u32 127, %v458_v34  ;;  %s570_s17 = scalar_lea.sflag [#allocation4], %s1265_s18  ;;  %p1376_p1 = scmp.ne.s32.totalorder %s1371_s26, 0 }
  0x6d   : > { %s708_s29 = sshll.u32 %s1285_s27, 3  ;;  %786 = vmatpush3.bf16.msra.mxu0 %v785_v6  ;;  %v809_v16 = vpack.c.bf16 %v467_v13, %v466_v12  ;;  %v337_v17 = vld [vmem:[#allocation5 + $0x30] sm:$0xff]  ;;  %v338_v18 = vld [vmem:[#allocation5 + $0x38] sm:$0xff]  ;;  %v340_v22 = vld [vmem:[#allocation5 + $0x48] sm:$0xff]  ;;  %s319_s27 = scalar_lea.vmem [#allocation8], %s704_s20 }
  0x6e   : > { %s327_s7 = scalar_lea.vmem %s1357_s1, %s708_s29  ;;  %787 = vmatprep.subr.bf16.mxu0 %v1055_v0  ;;  %v794_v20 = vpack.c.bf16 %v338_v18, %v337_v17  ;;  %v797_v23 = vpack.c.bf16 %v340_v22, %v339_v21  ;;  %v341_v24 = vld [vmem:[#allocation5 + $0x50] sm:$0xff]  ;;  %v342_v25 = vld [vmem:[#allocation5 + $0x58] sm:$0xff]  ;;  %v343_v27 = vld [vmem:[#allocation5 + $0x60] sm:$0xff]  ;;  %s323_s11 = scalar_lea.vmem %s1356_s0, %s708_s29 }
  0x6f   : > { %v328_v11 = vld [vmem:[%s327_s7] sm:$0xff]  ;;  %810 = vmatpush3.bf16.msra.mxu1 %v809_v16  ;;  %v800_v26 = vpack.c.bf16 %v342_v25, %v341_v24  ;;  %v344_v28 = vld [vmem:[#allocation5 + $0x68] sm:$0xff]  ;;  %v346_v31 = vld [vmem:[#allocation5 + $0x78] sm:$0xff]  ;;  %s583_s29 = sshll.u32 %s319_s27, 4  ;;  %s1314_s29 = int_to_ptr.vmem [resolvable:$true] %s583_s29 }
  0x70   : > { %461 = vperm.xlu0 %885, %v328_v11   ;;  %v329_v15 = vcvt.s32.f32 %v328_v11  ;;  %v803_v29 = vpack.c.bf16 %v344_v28, %v343_v27  ;;  %v345_v30 = vld [vmem:[#allocation5 + $0x70] sm:$0xff]  ;;  %v711_v38 = vld [vmem:[#allocation7 + $0x5] ss:$0 sm:$0xff]  ;;  %v710_v40 = vld [vmem:[#allocation7] ss:$0 sm:$0xff]  ;;  %s978_s12 = scalar_lea.vmem %s1314_s29, 128 }
  0x71   : > { %789 = vmatpush3.bf16.msra.mxu0 %v788_v8  ;;  %v806_v32 = vpack.c.bf16 %v346_v31, %v345_v30  ;;  %v330_v33 = vld [vmem:[%s323_s11] sm:$0xff]  ;;  %v712_v56 = vld [vmem:[#allocation7 + $0x1] ss:$0 sm:$0xff]  ;;  %v713_v58 = vld [vmem:[#allocation7 + $0x2] ss:$0 sm:$0xff]  ;;  %p979_p0 = scmp.ne.s32.totalorder %s1314_s29, %s978_s12 }
  0x72   : > { %790 = vmatprep.subr.bf16.mxu0 %v1055_v0  ;;  %v543_v61 = vld [vmem:[%s1271_s10] sm:$0xff]  ;;  %v716_v8 = vld [vmem:[#allocation7 + $0x3] ss:$0 sm:$0xff]  ;;  %v717_v10 = vld [vmem:[#allocation7 + $0x4] ss:$0 sm:$0xff]  ;;  %s719_s10 = sshll.u32 %s1117_s25, 7 }
  0x73   : > { %s1312_s7 = scalar_lea.hbm %s1362_s6, %s719_s10  ;;  %p980_p3 = pnand %p979_p0, %p1376_p1 }
  0x74   : > { %886 = vset.pattern.permute.xlu0 %v1059_v19  ;;  %s1060_s25 = smov [#allocation8]  }
  0x75   : > { %792 = vmatpush3.bf16.msra.mxu0 %v791_v14  ;;  %425 = vperm.xlu0 %886, %v329_v15   ;;  %p981_p7 = pneg %p980_p3  ;;  %s982_s20 = sshll.u32 %s1060_s25, 4  ;;  %s983_s20 = int_to_ptr.vmem [resolvable:$false] %s982_s20 }
  0x76   : > { %793 = vmatprep.subr.bf16.mxu0 %v1055_v0  ;;  %s984_s9 = scalar_lea.vmem %s983_s20, 256  ;;  %p985_p9 = scmp.lt.s32.totalorder %s1314_s29, %s983_s20 }
  0x77   : > { %p986_p12 = scmp.lt.s32.totalorder %s984_s9, %s978_s12 }
  0x79   : > { %795 = vmatpush3.bf16.msra.mxu0 %v794_v20  ;;  %887 = vset.pattern.permute.xlu0 %v1058_v2  ;;  %p987_p2 = por %p986_p12, %p985_p9 }
  0x7a   : > { %796 = vmatprep.subr.bf16.mxu0 %v1055_v0 }
  0x7b   : > { %p988_p13 = pnand %p987_p2, %p981_p7 }
  0x7d   : > { %798 = vmatpush3.bf16.msra.mxu0 %v797_v23 }
  0x7e   : > { %799 = vmatprep.subr.bf16.mxu0 %v1055_v0 }
  0x81   : > { %801 = vmatpush3.bf16.msra.mxu0 %v800_v26 }
  0x82   : > { %802 = vmatprep.subr.bf16.mxu0 %v1055_v0 }
  0x85   : > { %804 = vmatpush3.bf16.msra.mxu0 %v803_v29 }
  0x86   : > { %805 = vmatprep.subr.bf16.mxu0 %v1055_v0 }
  0x89   : > { %807 = vmatpush3.bf16.msra.mxu0 %v806_v32 }
  0x8c   : > { %775 = vmatmul.mubr.f32.vlgmr.msra.gmra.mrb[0].mxu0 %v330_v33 }
  0xef   : > { %v462_v36 = vpop.permute.xlu0 %461 }
  0xf0   : > { %vm463_vm2 = vcmp.eq.s32.totalorder %v462_v36, %v459_v35 }
  0xf1   : > { %v714_v37 = vsel %vm463_vm2, 1.0, %v1057_v1 }
  0xf2   : > { %782 = vmatmul.mubr.msk.f32.vlgmr.msra.gmra.mrb[0].mxu1 %vm468_vm1, %v714_v37 }
  0xf4   : > { %v426_v39 = vpop.permute.xlu0 %425 }
  0xf5   : > { %v432_v41 = vmul.f32 %v711_v38, %v426_v39 }
 0x15f   : > { %v418_v42 = vpop.f32.mrb[0].mxu0 }
 0x160   : > { %v419_v43 = vadd.f32 %v710_v40, %v418_v42  ;;  %v776_v44 = vpop.f32.mrb[1].mxu0 }
 0x162   : > { %v433_v45 = vadd.f32 %v432_v41, %v419_v43 }
 0x164   : > { %436 = vadd.xlane.f32.xlu1 %v433_v45 }
 0x1c5   : > { %v538_v46 = vpop.f32.mrb[0].mxu1 }
 0x1c6   : > { %v783_v47 = vpop.f32.mrb[1].mxu1 }
 0x1f1   : > { %v437_v48 = vpop.xlane.xlu1 %436 }
 0x1f2   : > { %v439_v49 = vmul.f32 0.0078125, %v437_v48 }
 0x1f4   : > { %v440_v50 = vsub.f32 %v433_v45, %v439_v49 }
 0x1f6   : > { %v441_v51 = vmul.f32 %v440_v50, %v440_v50 }
 0x1f8   : > { %442 = vadd.xlane.f32.xlu1 %v441_v51 }
 0x285   : > { %v443_v52 = vpop.xlane.xlu1 %442 }
 0x286   : > { %v444_v53 = vmul.f32 0.0078125, %v443_v52 }
 0x288   : > { %v445_v54 = vadd.f32 1e-12, %v444_v53 }
 0x28a   : > { %888 = vrsqrt.f32 %v445_v54 }
 0x294   : > { %v889_v55 = vpop.eup %888 }
 0x295   : > { %v447_v57 = vmul.f32 %v889_v55, %v440_v50 }
 0x297   : > { %v452_v59 = vmul.f32 %v712_v56, %v447_v57 }
 0x299   : > { %v457_v60 = vadd.f32 %v713_v58, %v452_v59 }
 0x29b   : > { %v542_v62 = vadd.f32 %v538_v46, %v457_v60 }
 0x29d   : > { %v544_v63 = vadd.f32 %v543_v61, %v542_v62 }
 0x29f   : > { %547 = vadd.xlane.f32.xlu1 %v544_v63 }
 0x32c   : > { %v548_v0 = vpop.xlane.xlu1 %547 }
 0x32d   : > { %v549_v1 = vmul.f32 0.0078125, %v548_v0 }
 0x32f   : > { %v550_v2 = vsub.f32 %v544_v63, %v549_v1 }
 0x331   : > { %v551_v3 = vmul.f32 %v550_v2, %v550_v2 }
 0x333   : > { %552 = vadd.xlane.f32.xlu0 %v551_v3 }
 0x3c0   : > { %v553_v4 = vpop.xlane.xlu0 %552 }
 0x3c1   : > { %v554_v5 = vmul.f32 0.0078125, %v553_v4 }
 0x3c3   : > { %v555_v6 = vadd.f32 1e-12, %v554_v5 }
 0x3c5   : > { %890 = vrsqrt.f32 %v555_v6 }
 0x3cf   : > { %v891_v7 = vpop.eup %890 }
 0x3d0   : > { %v557_v9 = vmul.f32 %v891_v7, %v550_v2 }
 0x3d2   : > { %v562_v11 = vmul.f32 %v716_v8, %v557_v9 }
 0x3d4   : > { %v567_v12 = vadd.f32 %v717_v10, %v562_v11 }
 0x3d6   : > { %568 = vst [vmem:[%s319_s27] sm:$0xff] %v567_v12 }
 0x3d7   : > { %991 = shalt.err (!%p988_p13)
}
 0x3d8   : > { %s992_s18 = scalar_lea.hbm %s1312_s7, 128  ;;  %s996_s8 = scalar_lea.hbm %s1362_s6, 256 }
 0x3d9   : > { %p993_p6 = scmp.ne.s32.totalorder %s1312_s7, %s992_s18  ;;  %p997_p5 = scmp.lt.u32.totalorder %s1312_s7, %s1362_s6 }
 0x3da   : > { %p998_p8 = scmp.lt.u32.totalorder %s996_s8, %s992_s18  ;;  %p1000_p0 = scmp.lt.u32.totalorder %s992_s18, %s1312_s7 }
 0x3db   : > { %p994_p10 = pnand %p993_p6, %p1376_p1 }
 0x3dc   : > { %p999_p11 = por %p998_p8, %p997_p5 }
 0x3dd   : > { %p995_p4 = pneg %p994_p10 }
 0x3de   : > { %p1001_p3 = por %p1000_p0, %p999_p11 }
 0x3e0   : > { %p1002_p7 = pnand %p1001_p3, %p995_p4 }
 0x3e2   : > { %1005 = shalt.err (!%p1002_p7)
}
 0x3e3   : > { %821 = dma.vmem_to_hbm [thread:$0]  (%p1376_p1), %s1314_s29, 128, %s1312_s7, %s570_s17  }
 0x3e4 PF: > { %s595_s27 = sand.u32 1, %s1036_s21   ;;  %p1377_p9 = scmp.ne.s32.totalorder %s1367_s28, 0 }
 0x3e5   : > { %p1378_p12 = scmp.ge.s32.totalorder %s1048_s24, 2  ;;  %s596_s14 = scalar_lea.sflag [#allocation4], %s595_s27 }
 0x3e7   : > { %p835_p2 = pnand %p1378_p12, %p1377_p9 }
 0x3e9   : > { %1031 = dma.done.wait (!%p835_p2), %s596_s14, 128  }
 0x3ea   : > { %1033 = vsyncadd (!%p835_p2), %s596_s14, 4294967168  ;;  %p20_p13 = scmp.ge.s32.totalorder %s1206_s19, 4   ;;  %s1379_s21 = smov %s1040_s22 }
 0x3eb   : > { %s1380_s22 = smov %s1044_s23  ;;  %s1381_s23 = smov %s1222_s30 }
 0x3ec   : > { %s1382_s24 = smov %s1206_s19  ;;  %22 = sbr.rel (!%p20_p13) target bundleno = 6 (0x6), region = 103 }
 0x3f3   :  { %601 = vsyncpa [#allocation3], 1 }
 0x3f4   :  { %603 = vsyncpa [#allocation3 + $0x1], 1 }
 0x3f5   :  { %604 = vsyncpa [#allocation6], 1 }
 0x3f6   :  { %605 = vsyncpa [#allocation4], 1 }
 0x3f7   :  { %607 = vsyncpa [#allocation4 + $0x1], 1 }

// kernel: tpu_custom_call.1
= control target key start
LH: loop header
LB: loop body
LE: loop exit
PB: predicated region body
PF: predicated region fallthrough
CT: control target
= control target key end

     0   :  { %11 = vsyncpa [#allocation3], 0  ;;  %s1356_s0 = inlined_call_operand.vmem [shape: f32[16,128], index: 0, kind: input, shape index: {}]   ;;  %s1357_s1 = inlined_call_operand.vmem [shape: s32[16,2], index: 1, kind: input, shape index: {}]   ;;  %s1358_s2 = inlined_call_operand.hbm [shape: f32[16,128], index: 2, kind: input, shape index: {}]   ;;  %s1359_s3 = inlined_call_operand.hbm [shape: f32[128,128], index: 3, kind: input, shape index: {}]   ;;  %s1360_s4 = inlined_call_operand.hbm [shape: f32[8,128], index: 4, kind: input, shape index: {}]   ;;  %s1361_s5 = inlined_call_operand.vmem [shape: f32[16,128], index: 5, kind: input, shape index: {}]   ;;  %s1362_s6 = inlined_call_operand.hbm [shape: f32[16,128], index: 6, kind: output, shape index: {}]  }
   0x1   :  { %13 = vsyncpa [#allocation3 + $0x1], 0 }
   0x2   :  { %14 = vsyncpa [#allocation6], 0 }
   0x3   :  { %15 = vsyncpa [#allocation4], 0 }
   0x4   :  { %17 = vsyncpa [#allocation4 + $0x1], 0  ;;  %s1096_s21 = smov 0   ;;  %s1098_s22 = smov 0  }
   0x5   :  { %s1100_s23 = smov 0   ;;  %s1102_s24 = smov 0  }
   0x6 LB: > { %s1117_s25 = sadd.s32 4294967295, %s1048_s24   ;;  %s696_s26 = sadd.s32 4294967294, %s1048_s24   ;;  %s1048_s24 = sphi %s1102_s24, %s1382_s24   ;;  %s1044_s23 = sphi %s1100_s23, %s1381_s23   ;;  %s1040_s22 = sphi %s1098_s22, %s1380_s22   ;;  %s1036_s21 = sphi %s1096_s21, %s1379_s21  }
   0x7   : > { %p95_p0 = scmp.ne.s32.totalorder %s1040_s22, %s1036_s21  ;;  %p1363_p1 = scmp.eq.s32.totalorder %s1117_s25, 0 }
   0x8   : > { %p188_p3 = scmp.eq.s32.totalorder %s696_s26, 1  ;;  %p697_p5 = scmp.ge.s32.totalorder %s1048_s24, 1 }
   0x9   : > { %p1126_p4 = por %p1363_p1, %p95_p0  ;;  %p195_p7 = scmp.lt.s32.totalorder %s1048_s24, 3 }
   0xa   : > { %p1131_p6 = por %p188_p3, %p95_p0  ;;  %s1050_s30 = smov [#allocation5]  }
   0xb   : > { %s1366_s27 = scalar_select %p1126_p4, 1, 0 }
   0xc   : > { %s1367_s28 = scalar_select %p1131_p6, 1, 0 }
   0xd   : > { %p1136_p8 = pnand %p697_p5, %p195_p7  ;;  %s207_s7 = sshll.u32 %s1050_s30, 4  ;;  %s1140_s7 = int_to_ptr.vmem [resolvable:$true] %s207_s7 }
   0xe   : > { %s1051_s9 = smov [#allocation7]   ;;  %s892_s13 = scalar_lea.hbm %s1359_s3, 2048 }
   0xf   : > { %p823_p9 = pneg %p1136_p8  ;;  %s221_s10 = sshll.u32 %s1051_s9, 4  ;;  %s1151_s10 = int_to_ptr.vmem [resolvable:$true] %s221_s10 }
  0x10   : > { %p893_p12 = scmp.ne.s32.totalorder %s1359_s3, %s892_s13  ;;  %p899_p5 = scmp.lt.u32.totalorder %s892_s13, %s1359_s3 }
  0x11   : > { %p1147_p11 = pnand %p823_p9, %p1363_p1 }
  0x13   : > { %p894_p13 = pneg %p1147_p11 }
  0x15   : > { %p895_p0 = pnand %p894_p13, %p893_p12 }
  0x17   : > { %p896_p3 = pneg %p895_p0 }
  0x19   : > { %p901_p7 = pnand %p899_p5, %p896_p3 }
  0x1b   : > { %904 = shalt.err (!%p901_p7)
}
  0x1c   : > { %s905_s18 = scalar_lea.vmem %s1140_s7, 2048  ;;  %p913_p2 = scmp.lt.s32.totalorder %s1140_s7, %s1140_s7 }
  0x1d   : > { %p906_p9 = scmp.ne.s32.totalorder %s1140_s7, %s905_s18  ;;  %p914_p12 = scmp.lt.s32.totalorder %s905_s18, %s905_s18 }
  0x1f   : > { %p908_p10 = pnand %p906_p9, %p894_p13  ;;  %p915_p0 = por %p914_p12, %p913_p2 }
  0x21   : > { %p909_p1 = pneg %p908_p10 }
  0x23   : > { %p916_p6 = pnand %p915_p0, %p909_p1 }
  0x25   : > { %919 = shalt.err (!%p916_p6)
}
  0x26   : > { %s1052_s19 = smov 128   ;;  %s1053_s20 = smov 8  }
  0x27   : > { %826 = dma.hbm_to_vmem [thread:$0]  (!%p1147_p11), %s1359_s3, 2048, %s1140_s7, [#allocation6], %s1052_s19, %s1052_s19, %s1053_s20  }
  0x28   : > { %s920_s12 = scalar_lea.hbm %s1360_s4, 128 }
  0x29   : > { %p921_p2 = scmp.ne.s32.totalorder %s1360_s4, %s920_s12  ;;  %p927_p10 = scmp.lt.u32.totalorder %s920_s12, %s1360_s4 }
  0x2b   : > { %p923_p1 = pnand %p921_p2, %p894_p13 }
  0x2d   : > { %p924_p6 = pneg %p923_p1 }
  0x2f   : > { %p929_p3 = pnand %p927_p10, %p924_p6 }
  0x31   : > { %932 = shalt.err (!%p929_p3)
}
  0x32   : > { %s933_s7 = scalar_lea.vmem %s1151_s10, 128  ;;  %p941_p12 = scmp.lt.s32.totalorder %s1151_s10, %s1151_s10 }
  0x33   : > { %p934_p5 = scmp.ne.s32.totalorder %s1151_s10, %s933_s7  ;;  %p942_p0 = scmp.lt.s32.totalorder %s933_s7, %s933_s7 }
  0x35   : > { %p936_p7 = pnand %p934_p5, %p894_p13  ;;  %p943_p2 = por %p942_p0, %p941_p12 }
  0x37   : > { %p937_p9 = pneg %p936_p7 }
  0x39   : > { %p944_p1 = pnand %p943_p2, %p937_p9 }
  0x3b   : > { %947 = shalt.err (!%p944_p1)
}
  0x3c   : > { %829 = dma.hbm_to_vmem [thread:$0]  (!%p1147_p11), %s1360_s4, 128, %s1151_s10, [#allocation6]  }
  0x3d   : > { %s1206_s19 = sadd.s32 1, %s1048_s24   ;;  %s82_s8 = sadd.s32 1, %s1044_s23 }
  0x3e   : > { %s79_s20 = ssub.s32 %s1048_s24, %s1206_s19  ;;  %p89_p13 = scmp.ne.s32.totalorder %s1044_s23, %s1040_s22 }
  0x3f   : > { %p80_p6 = scmp.eq.s32.totalorder %s79_s20, 0  ;;  %p90_p10 = scmp.eq.s32.totalorder %s1048_s24, 0 }
  0x40   : > { %p1370_p3 = scmp.eq.s32.totalorder %s1117_s25, 1  ;;  %p840_p7 = scmp.lt.s32.totalorder %s1048_s24, 2 }
  0x41   : > { %s1222_s30 = scalar_select %p80_p6, %s1044_s23, %s82_s8  }
  0x42   : > { %p1216_p5 = por %p1370_p3, %p89_p13  ;;  %p91_p9 = por %p90_p10, %p89_p13 }
  0x43   : > { %s249_s9 = sand.u32 1, %s1044_s23   ;;  %s702_s10 = sshll.u32 %s1048_s24, 7 }
  0x44   : > { %s1371_s26 = scalar_select %p1216_p5, 1, 0 }
  0x45   : > { %s701_s11 = sshll.u32 %s249_s9, 3  ;;  %s1229_s14 = scalar_lea.hbm %s1358_s2, %s702_s10 }
  0x46   : > { %s253_s15 = scalar_lea.vmem [#allocation2], %s701_s11  ;;  %p1233_p11 = pnand %p840_p7, %p91_p9 }
  0x47   : > { %s260_s16 = sshll.u32 %s253_s15, 4  ;;  %s250_s17 = scalar_lea.sflag [#allocation3], %s249_s9  ;;  %s1231_s16 = int_to_ptr.vmem [resolvable:$true] %s260_s16 }
  0x48   : > { %s948_s18 = scalar_lea.hbm %s1229_s14, 128  ;;  %p950_p0 = pneg %p1233_p11 }
  0x49   : > { %p949_p12 = scmp.ne.s32.totalorder %s1229_s14, %s948_s18  ;;  %s953_s11 = scalar_lea.hbm %s1358_s2, 256 }
  0x4a   : > { %p954_p13 = scmp.lt.u32.totalorder %s1229_s14, %s1358_s2  ;;  %p955_p6 = scmp.lt.u32.totalorder %s953_s11, %s948_s18 }
  0x4b   : > { %p951_p2 = pnand %p950_p0, %p949_p12  ;;  %p957_p3 = scmp.lt.u32.totalorder %s948_s18, %s1229_s14 }
  0x4c   : > { %p956_p10 = por %p955_p6, %p954_p13 }
  0x4d   : > { %p952_p1 = pneg %p951_p2 }
  0x4e   : > { %p958_p7 = por %p957_p3, %p956_p10 }
  0x50   : > { %p959_p9 = pnand %p958_p7, %p952_p1 }
  0x52   : > { %962 = shalt.err (!%p959_p9)
}
  0x53   : > { %s963_s9 = scalar_lea.vmem %s1231_s16, 128  ;;  %s1054_s13 = smov [#allocation2]  }
  0x54   : > { %p964_p12 = scmp.ne.s32.totalorder %s1231_s16, %s963_s9  ;;  %s968_s15 = sshll.u32 %s1054_s13, 4  ;;  %s969_s15 = int_to_ptr.vmem [resolvable:$false] %s968_s15 }
  0x55   : > { %s970_s8 = scalar_lea.vmem %s969_s15, 256  ;;  %p971_p4 = scmp.lt.s32.totalorder %s1231_s16, %s969_s15 }
  0x56   : > { %p966_p2 = pnand %p964_p12, %p950_p0  ;;  %p972_p13 = scmp.lt.s32.totalorder %s970_s8, %s963_s9 }
  0x58   : > { %p967_p5 = pneg %p966_p2  ;;  %p973_p6 = por %p972_p13, %p971_p4 }
  0x5a   : > { %p974_p10 = pnand %p973_p6, %p967_p5 }
  0x5c   : > { %977 = shalt.err (!%p974_p10)
}
  0x5d   : > { %833 = dma.hbm_to_vmem [thread:$0]  (!%p1233_p11), %s1229_s14, 128, %s1231_s16, %s250_s17  }
  0x5e   : > { %269 = sbr.rel (%p1136_p8) target bundleno = 996 (0x3e4), region = 44  ;;  %s1265_s18 = sand.u32 (!%p1136_p8), 1, %s1040_s22  }
  0x5f   : > { %s704_s20 = sshll.u32 (!%p1136_p8), %s1265_s18, 3  ;;  %s272_s11 = scalar_lea.sflag (!%p1136_p8), [#allocation3], %s1265_s18 }
  0x60   : > { %s1271_s10 = scalar_lea.vmem (!%p1136_p8), [#allocation2], %s704_s20  ;;  %p1373_p4 = scmp.ne.s32.totalorder (!%p1136_p8), %s1366_s27, 0 }
  0x65   : > { %1023 = dma.done.wait (%p1373_p4), %s272_s11, 128  }
  0x66   : > { %1025 = vsyncadd (%p1373_p4), %s272_s11, 4294967168  ;;  %p1374_p5 = scmp.eq.s32.totalorder %s1117_s25, 0 }
  0x68   : > { %1027 = dma.done.wait (%p1374_p5), [#allocation6], 2176   ;;  %p1375_p8 = pmov %p1374_p5 }
  0x69   : > { %p320_p11 = scmp.lt.s32.totalorder %s1117_s25, 1  ;;  %v1055_v0 = vmov 0.0|0.0   ;;  %vm1056_vm0 = vmmov 0   ;;  %v1057_v1 = vmov 0.0   ;;  %v1058_v2 = vmov 0   ;;  %v331_v3 = vld [vmem:[#allocation5] sm:$0xff] }
  0x6a   : > { %1029 = vsyncadd (%p1375_p8), [#allocation6], 4294965120  ;;  %784 = vmatprep.subr.bf16.mxu0 %v1055_v0  ;;  %774 = vmatprep.mubr.msk.f32.mxu0 %vm1056_vm0, %v1057_v1  ;;  %v332_v4 = vld [vmem:[#allocation5 + $0x8] sm:$0xff]  ;;  %v333_v5 = vld [vmem:[#allocation5 + $0x10] sm:$0xff]  ;;  %v1059_v19 = vmov 1   ;;  %v458_v34 = vlaneseq  ;;  %vm468_vm1 = vcmask 130048  }
  0x6b   : > { %885 = vset.pattern.permute.xlu0 %v1058_v2  ;;  %808 = vmatprep.subr.bf16.mxu1 %v1055_v0  ;;  %s1285_s27 = scalar_select %p320_p11, %s1117_s25, 1  ;;  %v785_v6 = vpack.c.bf16 %v332_v4, %v331_v3  ;;  %v334_v7 = vld [vmem:[#allocation5 + $0x18] sm:$0xff]  ;;  %v335_v9 = vld [vmem:[#allocation5 + $0x20] sm:$0xff]  ;;  %v336_v10 = vld [vmem:[#allocation5 + $0x28] sm:$0xff] }
  0x6c   : > { %781 = vmatprep.mubr.msk.f32.mxu1 %vm1056_vm0, %v1057_v1  ;;  %v788_v8 = vpack.c.bf16 %v334_v7, %v333_v5  ;;  %v466_v12 = vld [vmem:[%s1361_s5] sm:$0xff]  ;;  %v467_v13 = vld [vmem:[%s1361_s5 + $0x8] sm:$0xff]  ;;  %v791_v14 = vpack.c.bf16 %v336_v10, %v335_v9  ;;  %v339_v21 = vld [vmem:[#allocation5 + $0x40] sm:$0xff]  ;;  %v459_v35 = vand.u32 127, %v458_v34  ;;  %s570_s17 = scalar_lea.sflag [#allocation4], %s1265_s18  ;;  %p1376_p1 = scmp.ne.s32.totalorder %s1371_s26, 0 }
  0x6d   : > { %s708_s29 = sshll.u32 %s1285_s27, 3  ;;  %786 = vmatpush3.bf16.msra.mxu0 %v785_v6  ;;  %v809_v16 = vpack.c.bf16 %v467_v13, %v466_v12  ;;  %v337_v17 = vld [vmem:[#allocation5 + $0x30] sm:$0xff]  ;;  %v338_v18 = vld [vmem:[#allocation5 + $0x38] sm:$0xff]  ;;  %v340_v22 = vld [vmem:[#allocation5 + $0x48] sm:$0xff]  ;;  %s319_s27 = scalar_lea.vmem [#allocation8], %s704_s20 }
  0x6e   : > { %s327_s7 = scalar_lea.vmem %s1357_s1, %s708_s29  ;;  %787 = vmatprep.subr.bf16.mxu0 %v1055_v0  ;;  %v794_v20 = vpack.c.bf16 %v338_v18, %v337_v17  ;;  %v797_v23 = vpack.c.bf16 %v340_v22, %v339_v21  ;;  %v341_v24 = vld [vmem:[#allocation5 + $0x50] sm:$0xff]  ;;  %v342_v25 = vld [vmem:[#allocation5 + $0x58] sm:$0xff]  ;;  %v343_v27 = vld [vmem:[#allocation5 + $0x60] sm:$0xff]  ;;  %s323_s11 = scalar_lea.vmem %s1356_s0, %s708_s29 }
  0x6f   : > { %v328_v11 = vld [vmem:[%s327_s7] sm:$0xff]  ;;  %810 = vmatpush3.bf16.msra.mxu1 %v809_v16  ;;  %v800_v26 = vpack.c.bf16 %v342_v25, %v341_v24  ;;  %v344_v28 = vld [vmem:[#allocation5 + $0x68] sm:$0xff]  ;;  %v346_v31 = vld [vmem:[#allocation5 + $0x78] sm:$0xff]  ;;  %s583_s29 = sshll.u32 %s319_s27, 4  ;;  %s1314_s29 = int_to_ptr.vmem [resolvable:$true] %s583_s29 }
  0x70   : > { %461 = vperm.xlu0 %885, %v328_v11   ;;  %v329_v15 = vcvt.s32.f32 %v328_v11  ;;  %v803_v29 = vpack.c.bf16 %v344_v28, %v343_v27  ;;  %v345_v30 = vld [vmem:[#allocation5 + $0x70] sm:$0xff]  ;;  %v711_v38 = vld [vmem:[#allocation7 + $0x5] ss:$0 sm:$0xff]  ;;  %v710_v40 = vld [vmem:[#allocation7] ss:$0 sm:$0xff]  ;;  %s978_s12 = scalar_lea.vmem %s1314_s29, 128 }
  0x71   : > { %789 = vmatpush3.bf16.msra.mxu0 %v788_v8  ;;  %v806_v32 = vpack.c.bf16 %v346_v31, %v345_v30  ;;  %v330_v33 = vld [vmem:[%s323_s11] sm:$0xff]  ;;  %v712_v56 = vld [vmem:[#allocation7 + $0x1] ss:$0 sm:$0xff]  ;;  %v713_v58 = vld [vmem:[#allocation7 + $0x2] ss:$0 sm:$0xff]  ;;  %p979_p0 = scmp.ne.s32.totalorder %s1314_s29, %s978_s12 }
  0x72   : > { %790 = vmatprep.subr.bf16.mxu0 %v1055_v0  ;;  %v543_v61 = vld [vmem:[%s1271_s10] sm:$0xff]  ;;  %v716_v8 = vld [vmem:[#allocation7 + $0x3] ss:$0 sm:$0xff]  ;;  %v717_v10 = vld [vmem:[#allocation7 + $0x4] ss:$0 sm:$0xff]  ;;  %s719_s10 = sshll.u32 %s1117_s25, 7 }
  0x73   : > { %s1312_s7 = scalar_lea.hbm %s1362_s6, %s719_s10  ;;  %p980_p3 = pnand %p979_p0, %p1376_p1 }
  0x74   : > { %886 = vset.pattern.permute.xlu0 %v1059_v19  ;;  %s1060_s25 = smov [#allocation8]  }
  0x75   : > { %792 = vmatpush3.bf16.msra.mxu0 %v791_v14  ;;  %425 = vperm.xlu0 %886, %v329_v15   ;;  %p981_p7 = pneg %p980_p3  ;;  %s982_s20 = sshll.u32 %s1060_s25, 4  ;;  %s983_s20 = int_to_ptr.vmem [resolvable:$false] %s982_s20 }
  0x76   : > { %793 = vmatprep.subr.bf16.mxu0 %v1055_v0  ;;  %s984_s9 = scalar_lea.vmem %s983_s20, 256  ;;  %p985_p9 = scmp.lt.s32.totalorder %s1314_s29, %s983_s20 }
  0x77   : > { %p986_p12 = scmp.lt.s32.totalorder %s984_s9, %s978_s12 }
  0x79   : > { %795 = vmatpush3.bf16.msra.mxu0 %v794_v20  ;;  %887 = vset.pattern.permute.xlu0 %v1058_v2  ;;  %p987_p2 = por %p986_p12, %p985_p9 }
  0x7a   : > { %796 = vmatprep.subr.bf16.mxu0 %v1055_v0 }
  0x7b   : > { %p988_p13 = pnand %p987_p2, %p981_p7 }
  0x7d   : > { %798 = vmatpush3.bf16.msra.mxu0 %v797_v23 }
  0x7e   : > { %799 = vmatprep.subr.bf16.mxu0 %v1055_v0 }
  0x81   : > { %801 = vmatpush3.bf16.msra.mxu0 %v800_v26 }
  0x82   : > { %802 = vmatprep.subr.bf16.mxu0 %v1055_v0 }
  0x85   : > { %804 = vmatpush3.bf16.msra.mxu0 %v803_v29 }
  0x86   : > { %805 = vmatprep.subr.bf16.mxu0 %v1055_v0 }
  0x89   : > { %807 = vmatpush3.bf16.msra.mxu0 %v806_v32 }
  0x8c   : > { %775 = vmatmul.mubr.f32.vlgmr.msra.gmra.mrb[0].mxu0 %v330_v33 }
  0xef   : > { %v462_v36 = vpop.permute.xlu0 %461 }
  0xf0   : > { %vm463_vm2 = vcmp.eq.s32.totalorder %v462_v36, %v459_v35 }
  0xf1   : > { %v714_v37 = vsel %vm463_vm2, 1.0, %v1057_v1 }
  0xf2   : > { %782 = vmatmul.mubr.msk.f32.vlgmr.msra.gmra.mrb[0].mxu1 %vm468_vm1, %v714_v37 }
  0xf4   : > { %v426_v39 = vpop.permute.xlu0 %425 }
  0xf5   : > { %v432_v41 = vmul.f32 %v711_v38, %v426_v39 }
 0x15f   : > { %v418_v42 = vpop.f32.mrb[0].mxu0 }
 0x160   : > { %v419_v43 = vadd.f32 %v710_v40, %v418_v42  ;;  %v776_v44 = vpop.f32.mrb[1].mxu0 }
 0x162   : > { %v433_v45 = vadd.f32 %v432_v41, %v419_v43 }
 0x164   : > { %436 = vadd.xlane.f32.xlu1 %v433_v45 }
 0x1c5   : > { %v538_v46 = vpop.f32.mrb[0].mxu1 }
 0x1c6   : > { %v783_v47 = vpop.f32.mrb[1].mxu1 }
 0x1f1   : > { %v437_v48 = vpop.xlane.xlu1 %436 }
 0x1f2   : > { %v439_v49 = vmul.f32 0.0078125, %v437_v48 }
 0x1f4   : > { %v440_v50 = vsub.f32 %v433_v45, %v439_v49 }
 0x1f6   : > { %v441_v51 = vmul.f32 %v440_v50, %v440_v50 }
 0x1f8   : > { %442 = vadd.xlane.f32.xlu1 %v441_v51 }
 0x285   : > { %v443_v52 = vpop.xlane.xlu1 %442 }
 0x286   : > { %v444_v53 = vmul.f32 0.0078125, %v443_v52 }
 0x288   : > { %v445_v54 = vadd.f32 1e-12, %v444_v53 }
 0x28a   : > { %888 = vrsqrt.f32 %v445_v54 }
 0x294   : > { %v889_v55 = vpop.eup %888 }
 0x295   : > { %v447_v57 = vmul.f32 %v889_v55, %v440_v50 }
 0x297   : > { %v452_v59 = vmul.f32 %v712_v56, %v447_v57 }
 0x299   : > { %v457_v60 = vadd.f32 %v713_v58, %v452_v59 }
 0x29b   : > { %v542_v62 = vadd.f32 %v538_v46, %v457_v60 }
 0x29d   : > { %v544_v63 = vadd.f32 %v543_v61, %v542_v62 }
 0x29f   : > { %547 = vadd.xlane.f32.xlu1 %v544_v63 }
 0x32c   : > { %v548_v0 = vpop.xlane.xlu1 %547 }
 0x32d   : > { %v549_v1 = vmul.f32 0.0078125, %v548_v0 }
 0x32f   : > { %v550_v2 = vsub.f32 %v544_v63, %v549_v1 }
 0x331   : > { %v551_v3 = vmul.f32 %v550_v2, %v550_v2 }
 0x333   : > { %552 = vadd.xlane.f32.xlu0 %v551_v3 }
 0x3c0   : > { %v553_v4 = vpop.xlane.xlu0 %552 }
 0x3c1   : > { %v554_v5 = vmul.f32 0.0078125, %v553_v4 }
 0x3c3   : > { %v555_v6 = vadd.f32 1e-12, %v554_v5 }
 0x3c5   : > { %890 = vrsqrt.f32 %v555_v6 }
 0x3cf   : > { %v891_v7 = vpop.eup %890 }
 0x3d0   : > { %v557_v9 = vmul.f32 %v891_v7, %v550_v2 }
 0x3d2   : > { %v562_v11 = vmul.f32 %v716_v8, %v557_v9 }
 0x3d4   : > { %v567_v12 = vadd.f32 %v717_v10, %v562_v11 }
 0x3d6   : > { %568 = vst [vmem:[%s319_s27] sm:$0xff] %v567_v12 }
 0x3d7   : > { %991 = shalt.err (!%p988_p13)
}
 0x3d8   : > { %s992_s18 = scalar_lea.hbm %s1312_s7, 128  ;;  %s996_s8 = scalar_lea.hbm %s1362_s6, 256 }
 0x3d9   : > { %p993_p6 = scmp.ne.s32.totalorder %s1312_s7, %s992_s18  ;;  %p997_p5 = scmp.lt.u32.totalorder %s1312_s7, %s1362_s6 }
 0x3da   : > { %p998_p8 = scmp.lt.u32.totalorder %s996_s8, %s992_s18  ;;  %p1000_p0 = scmp.lt.u32.totalorder %s992_s18, %s1312_s7 }
 0x3db   : > { %p994_p10 = pnand %p993_p6, %p1376_p1 }
 0x3dc   : > { %p999_p11 = por %p998_p8, %p997_p5 }
 0x3dd   : > { %p995_p4 = pneg %p994_p10 }
 0x3de   : > { %p1001_p3 = por %p1000_p0, %p999_p11 }
 0x3e0   : > { %p1002_p7 = pnand %p1001_p3, %p995_p4 }
 0x3e2   : > { %1005 = shalt.err (!%p1002_p7)
}
 0x3e3   : > { %821 = dma.vmem_to_hbm [thread:$0]  (%p1376_p1), %s1314_s29, 128, %s1312_s7, %s570_s17  }
 0x3e4 PF: > { %s595_s27 = sand.u32 1, %s1036_s21   ;;  %p1377_p9 = scmp.ne.s32.totalorder %s1367_s28, 0 }
 0x3e5   : > { %p1378_p12 = scmp.ge.s32.totalorder %s1048_s24, 2  ;;  %s596_s14 = scalar_lea.sflag [#allocation4], %s595_s27 }
 0x3e7   : > { %p835_p2 = pnand %p1378_p12, %p1377_p9 }
 0x3e9   : > { %1031 = dma.done.wait (!%p835_p2), %s596_s14, 128  }
 0x3ea   : > { %1033 = vsyncadd (!%p835_p2), %s596_s14, 4294967168  ;;  %p20_p13 = scmp.ge.s32.totalorder %s1206_s19, 4   ;;  %s1379_s21 = smov %s1040_s22 }
 0x3eb   : > { %s1380_s22 = smov %s1044_s23  ;;  %s1381_s23 = smov %s1222_s30 }
 0x3ec   : > { %s1382_s24 = smov %s1206_s19  ;;  %22 = sbr.rel (!%p20_p13) target bundleno = 6 (0x6), region = 103 }
 0x3f3   :  { %601 = vsyncpa [#allocation3], 1 }
 0x3f4   :  { %603 = vsyncpa [#allocation3 + $0x1], 1 }
 0x3f5   :  { %604 = vsyncpa [#allocation6], 1 }
 0x3f6   :  { %605 = vsyncpa [#allocation4], 1 }
 0x3f7   :  { %607 = vsyncpa [#allocation4 + $0x1], 1 }

</bundles_post_ra>
